<compile_context>
chip_gen: v6e
topology: v6e:2x2x1
jax: 0.10.0
libtpu: 0.0.40
codegen_flags: <defaults>
</compile_context>

<pallas_src>
import jax
import jax.numpy as jnp
from jax import lax
from jax.experimental import pallas as pl
from jax.experimental.pallas import tpu as pltpu


# ----------------------------- Pallas kernels ------------------------------

def _conv_block_kernel(x_ref, w_ref, b_ref, o_ref):
    """Fused conv(3x3, pad=1) + bias + ReLU + maxpool(2x2).

    x_ref: [4, K, bm]   corner (py*2+px), patch feature (dy*3+dx)*Cin+c, position
    w_ref: [Cout, K]    b_ref: [Cout, 1]    o_ref: [Cout, bm]
    """
    w = w_ref[...]
    acc = jnp.dot(w, x_ref[0], preferred_element_type=jnp.float32)
    for c in range(1, 4):
        acc = jnp.maximum(
            acc, jnp.dot(w, x_ref[c], preferred_element_type=jnp.float32))
    # relu(max_c(conv_c + b)) == max_c(relu(conv_c + b))  -> correct pool-after-relu.
    o_ref[...] = jnp.maximum(acc + b_ref[...], 0.0).astype(o_ref.dtype)


def _classifier_kernel(x_ref, w1_ref, b1_ref, w2_ref, b2_ref, o_ref):
    """Fused Linear(F->128) + ReLU + Linear(128->num_classes)."""
    h = jnp.dot(x_ref[...], w1_ref[...],
                preferred_element_type=jnp.float32) + b1_ref[...]
    h = jnp.maximum(h, 0.0)
    # TODO(synk): nn.Dropout treated as eval-mode identity.
    y = jnp.dot(h, w2_ref[...],
                preferred_element_type=jnp.float32) + b2_ref[...]
    o_ref[...] = y.astype(o_ref.dtype)


# ----------------------------- kernel wrappers ------------------------------

def _build_pooled_patches(x_cnhw):
    """JAX glue: im2col patches grouped by 2x2-pool corner.

    x_cnhw: [C, N, H, W]  ->  [4, 9*C, N*(H//2)*(W//2)]
    out[py*2+px, (dy*3+dx)*C + c, n*Ho*Wo + ho*Wo + wo]
        = x_pad[c, n, 2*ho+py+dy, 2*wo+px+dx]
    """
    C, N, H, W = x_cnhw.shape
    assert H % 2 == 0 and W % 2 == 0
    Ho, Wo = H // 2, W // 2
    xp = jnp.pad(x_cnhw, ((0, 0), (0, 0), (1, 1), (1, 1)))
    shifts = jnp.stack([xp[:, :, dy:dy + H, dx:dx + W]
                        for dy in range(3) for dx in range(3)], axis=0)
    s = shifts.reshape(9, C, N, Ho, 2, Wo, 2)
    s = jnp.transpose(s, (4, 6, 0, 1, 2, 3, 5))          # (py, px, k, C, N, Ho, Wo)
    return s.reshape(4, 9 * C, N * Ho * Wo)


def pallas_conv_block(patches, wt, b, *, block_m=512):
    """patches:[4,K,M]  wt:[Cout,K]  b:[Cout]  ->  [Cout, M] (post relu+pool)."""
    _, K, M = patches.shape
    Cout = wt.shape[0]
    bm = block_m if (M % block_m == 0) else M             # full-dim block for toy sizes
    grid = (M // bm,)
    return pl.pallas_call(
        _conv_block_kernel,
        out_shape=jax.ShapeDtypeStruct((Cout, M), jnp.float32),
        grid=grid,
        in_specs=[
            pl.BlockSpec((4, K, bm), lambda i: (0, 0, i)),
            pl.BlockSpec((Cout, K), lambda i: (0, 0)),
            pl.BlockSpec((Cout, 1), lambda i: (0, 0)),
        ],
        out_specs=pl.BlockSpec((Cout, bm), lambda i: (0, i)),
        compiler_params=pltpu.CompilerParams(
            dimension_semantics=("parallel",)),            # shards across v7x TCs at scale
    )(patches, wt, b.reshape(Cout, 1))


def pallas_classifier(flat, w1t, b1, w2t, b2):
    """flat:[N,F] w1t:[F,128] b1:[128] w2t:[128,C] b2:[C] -> [N,C]."""
    Nb, F = flat.shape
    H1 = w1t.shape[1]
    C = w2t.shape[1]
    return pl.pallas_call(
        _classifier_kernel,
        out_shape=jax.ShapeDtypeStruct((Nb, C), jnp.float32),
        grid=(1,),
        in_specs=[
            pl.BlockSpec((Nb, F), lambda i: (0, 0)),
            pl.BlockSpec((F, H1), lambda i: (0, 0)),
            pl.BlockSpec((1, H1), lambda i: (0, 0)),
            pl.BlockSpec((H1, C), lambda i: (0, 0)),
            pl.BlockSpec((1, C), lambda i: (0, 0)),
        ],
        out_specs=pl.BlockSpec((Nb, C), lambda i: (0, 0)),
        compiler_params=pltpu.CompilerParams(
            dimension_semantics=("arbitrary",)),
    )(flat, w1t, b1.reshape(1, H1), w2t, b2.reshape(1, C))


# ------------------------------- AdriaanNet ---------------------------------

def init_params(key, config):
    hs = config["hidden_size"]
    num_layers = config["num_layers"]
    image_size = config["image_size"]
    num_classes = config["num_classes"]

    conv_params = []
    cin, cout = 3, hs
    for _ in range(num_layers):
        key, kw, kb = jax.random.split(key, 3)
        w = jax.random.normal(kw, (cout, cin, 3, 3), jnp.float32) * 0.1
        b = jax.random.normal(kb, (cout,), jnp.float32) * 0.01
        conv_params.append((w, b))
        cin, cout = cout, cout * 2

    current_size = cin
    final_size = image_size // (2 ** num_layers)
    flat_features = current_size * final_size * final_size

    key, k1, k2, k3, k4 = jax.random.split(key, 5)
    w1 = jax.random.normal(k1, (128, flat_features), jnp.float32) * 0.05
    b1 = jax.random.normal(k2, (128,), jnp.float32) * 0.01
    w2 = jax.random.normal(k3, (num_classes, 128), jnp.float32) * 0.05
    b2 = jax.random.normal(k4, (num_classes,), jnp.float32) * 0.01
    return {"conv": conv_params, "fc1": (w1, b1), "fc2": (w2, b2)}


def adriaan_net_forward(x_nchw, params):
    """Forward pass matching PyTorch AdriaanNet (eval mode)."""
    N = x_nchw.shape[0]
    x = jnp.transpose(x_nchw, (1, 0, 2, 3))               # [C, N, H, W] (tiny, once)
    for (w, b) in params["conv"]:
        Cout = w.shape[0]
        C, _, H, W = x.shape
        Ho, Wo = H // 2, W // 2
        patches = _build_pooled_patches(x)                 # [4, 9*C, N*Ho*Wo]
        wt = jnp.transpose(w, (0, 2, 3, 1)).reshape(Cout, 9 * C)
        y = pallas_conv_block(patches, wt, b)              # [Cout, N*Ho*Wo]
        x = y.reshape(Cout, N, Ho, Wo)                     # pure reshape, no transpose
    # nn.Flatten on NCHW ordering (tiny 512-element transpose).
    flat = jnp.transpose(x, (1, 0, 2, 3)).reshape(N, -1)
    w1, b1 = params["fc1"]
    w2, b2 = params["fc2"]
    return pallas_classifier(flat, w1.T, b1, w2.T, b2)


# ------------------------------ pure-JAX ref ---------------------------------

def reference_forward(x_nchw, params):
    x = jnp.transpose(x_nchw, (0, 2, 3, 1))
    for (w, b) in params["conv"]:
        y = lax.conv_general_dilated(
            x, jnp.transpose(w, (2, 3, 1, 0)), (1, 1), "SAME",
            dimension_numbers=("NHWC", "HWIO", "NHWC"))
        y = jax.nn.relu(y + b)
        x = lax.reduce_window(y, -jnp.inf, lax.max,
                              (1, 2, 2, 1), (1, 2, 2, 1), "VALID")
    N = x.shape[0]
    flat = jnp.transpose(x, (0, 3, 1, 2)).reshape(N, -1)
    w1, b1 = params["fc1"]
    h = jax.nn.relu(flat @ w1.T + b1)
    w2, b2 = params["fc2"]
    return h @ w2.T + b2


# --------------------------------- main --------------------------------------

if __name__ == "__main__":
    config = {
        "hidden_size": 8,
        "num_layers": 2,
        "image_size": 16,
        "num_classes": 10,
        "dropout": 0.5,
    }
    key = jax.random.PRNGKey(0)
    key, kx = jax.random.split(key)
    x = jax.random.normal(kx, (2, 3, 16, 16), jnp.float32)   # NCHW like PyTorch
    params = init_params(key, config)

    out = adriaan_net_forward(x, params)
    out = jax.block_until_ready(out)
    assert out.shape == (2, config["num_classes"]), out.shape

    ref = jax.block_until_ready(reference_forward(x, params))
    assert jnp.allclose(out, ref, rtol=1e-4, atol=1e-4), (
        float(jnp.max(jnp.abs(out - ref))))

    print("KERNEL_OK")
</pallas_src>

<mosaic_0001>
module attributes {stable_mosaic.version = 11 : i64} {
  func.func @_conv_block_kernel(%arg0: i32, %arg1: memref<4x27x128xf32, #tpu.memory_space<vmem>>, %arg2: memref<8x27xf32, #tpu.memory_space<vmem>>, %arg3: memref<8x1xf32, #tpu.memory_space<vmem>>, %arg4: memref<8x128xf32, #tpu.memory_space<vmem>>) attributes {dimension_semantics = [#tpu.dimension_semantics<parallel>], iteration_bounds = array<i64: 1>, scalar_prefetch = 0 : i64, scratch_operands = 0 : i64, tpu.core_type = #tpu.core_type<tc>, window_params = [{transform_indices = @transform_0, window_bounds = array<i64: 4, 27, 128>}, {pipeline_mode = #tpu.pipeline_mode<synchronous>, transform_indices = @transform_1, window_bounds = array<i64: 8, 27>}, {pipeline_mode = #tpu.pipeline_mode<synchronous>, transform_indices = @transform_2, window_bounds = array<i64: 8, 1>}, {transform_indices = @transform_3, window_bounds = array<i64: 8, 128>}]} {
    %c0 = arith.constant 0 : index
    %c0_0 = arith.constant 0 : index
    %0 = vector.load %arg2[%c0, %c0_0] : memref<8x27xf32, #tpu.memory_space<vmem>>, vector<8x27xf32>
    %c0_1 = arith.constant 0 : index
    %c0_2 = arith.constant 0 : index
    %c0_3 = arith.constant 0 : index
    %1 = vector.load %arg1[%c0_1, %c0_2, %c0_3] : memref<4x27x128xf32, #tpu.memory_space<vmem>>, vector<1x27x128xf32>
    %2 = vector.shape_cast %1 : vector<1x27x128xf32> to vector<27x128xf32>
    %cst = arith.constant dense<0.000000e+00> : vector<8x128xf32>
    %3 = tpu.matmul %0, %2, %cst {dimension_numbers = #tpu.dot_dimension_numbers<[1], [0], [0], [1], [0, 0, 1, 1], [], []>} : vector<8x27xf32>, vector<27x128xf32>, vector<8x128xf32> -> vector<8x128xf32>
    %c1 = arith.constant 1 : index
    %c0_4 = arith.constant 0 : index
    %c0_5 = arith.constant 0 : index
    %4 = vector.load %arg1[%c1, %c0_4, %c0_5] : memref<4x27x128xf32, #tpu.memory_space<vmem>>, vector<1x27x128xf32>
    %5 = vector.shape_cast %4 : vector<1x27x128xf32> to vector<27x128xf32>
    %cst_6 = arith.constant dense<0.000000e+00> : vector<8x128xf32>
    %6 = tpu.matmul %0, %5, %cst_6 {dimension_numbers = #tpu.dot_dimension_numbers<[1], [0], [0], [1], [0, 0, 1, 1], [], []>} : vector<8x27xf32>, vector<27x128xf32>, vector<8x128xf32> -> vector<8x128xf32>
    %7 = arith.maximumf %3, %6 : vector<8x128xf32>
    %c2 = arith.constant 2 : index
    %c0_7 = arith.constant 0 : index
    %c0_8 = arith.constant 0 : index
    %8 = vector.load %arg1[%c2, %c0_7, %c0_8] : memref<4x27x128xf32, #tpu.memory_space<vmem>>, vector<1x27x128xf32>
    %9 = vector.shape_cast %8 : vector<1x27x128xf32> to vector<27x128xf32>
    %cst_9 = arith.constant dense<0.000000e+00> : vector<8x128xf32>
    %10 = tpu.matmul %0, %9, %cst_9 {dimension_numbers = #tpu.dot_dimension_numbers<[1], [0], [0], [1], [0, 0, 1, 1], [], []>} : vector<8x27xf32>, vector<27x128xf32>, vector<8x128xf32> -> vector<8x128xf32>
    %11 = arith.maximumf %7, %10 : vector<8x128xf32>
    %c3 = arith.constant 3 : index
    %c0_10 = arith.constant 0 : index
    %c0_11 = arith.constant 0 : index
    %12 = vector.load %arg1[%c3, %c0_10, %c0_11] : memref<4x27x128xf32, #tpu.memory_space<vmem>>, vector<1x27x128xf32>
    %13 = vector.shape_cast %12 : vector<1x27x128xf32> to vector<27x128xf32>
    %cst_12 = arith.constant dense<0.000000e+00> : vector<8x128xf32>
    %14 = tpu.matmul %0, %13, %cst_12 {dimension_numbers = #tpu.dot_dimension_numbers<[1], [0], [0], [1], [0, 0, 1, 1], [], []>} : vector<8x27xf32>, vector<27x128xf32>, vector<8x128xf32> -> vector<8x128xf32>
    %15 = arith.maximumf %11, %14 : vector<8x128xf32>
    %c0_13 = arith.constant 0 : index
    %c0_14 = arith.constant 0 : index
    %16 = vector.load %arg3[%c0_13, %c0_14] : memref<8x1xf32, #tpu.memory_space<vmem>>, vector<8x1xf32>
    %17 = vector.broadcast %16 : vector<8x1xf32> to vector<8x128xf32>
    %18 = arith.addf %15, %17 : vector<8x128xf32>
    %cst_15 = arith.constant 0.000000e+00 : f32
    %19 = vector.broadcast %cst_15 : f32 to vector<8x128xf32>
    %20 = arith.maximumf %18, %19 : vector<8x128xf32>
    %c0_16 = arith.constant 0 : index
    %c0_17 = arith.constant 0 : index
    %21 = vector.load %arg4[%c0_16, %c0_17] : memref<8x128xf32, #tpu.memory_space<vmem>>, vector<8x128xf32>
    tpu.vector_store %arg4[%c0_16, %c0_17], %20 {strides = array<i32>} : memref<8x128xf32, #tpu.memory_space<vmem>>, vector<8x128xf32>,
    return
  }
  func.func @transform_0(%arg0: i32) -> (i32, i32, i32) {
    %c0_i32 = arith.constant 0 : i32
    %c0_i32_0 = arith.constant 0 : i32
    %c0_i32_1 = arith.constant 0 : i32
    return %c0_i32, %c0_i32_0, %arg0 : i32, i32, i32
  }
  func.func @transform_1(%arg0: i32) -> (i32, i32) {
    %c0_i32 = arith.constant 0 : i32
    %c0_i32_0 = arith.constant 0 : i32
    %c0_i32_1 = arith.constant 0 : i32
    return %c0_i32, %c0_i32_0 : i32, i32
  }
  func.func @transform_2(%arg0: i32) -> (i32, i32) {
    %c0_i32 = arith.constant 0 : i32
    %c0_i32_0 = arith.constant 0 : i32
    %c0_i32_1 = arith.constant 0 : i32
    return %c0_i32, %c0_i32_0 : i32, i32
  }
  func.func @transform_3(%arg0: i32) -> (i32, i32) {
    %c0_i32 = arith.constant 0 : i32
    %c0_i32_0 = arith.constant 0 : i32
    return %c0_i32, %arg0 : i32, i32
  }
}

</mosaic_0001>

<bundles_post_ra>
// kernel: tpu_custom_call.1
= control target key start
LH: loop header
LB: loop body
LE: loop exit
PB: predicated region body
PF: predicated region fallthrough
CT: control target
= control target key end

     0   :  { %vm24_vm0 = vcmask 1042432   ;;  %v469_v2 = vmov 0.0   ;;  %vm20_vm1 = vcmask 220160   ;;  %s562_s0 = inlined_call_operand.vmem [shape: f32[4,27,128], index: 0, kind: input, shape index: {}]   ;;  %s563_s1 = inlined_call_operand.vmem [shape: f32[8,27], index: 1, kind: input, shape index: {}]   ;;  %s564_s2 = inlined_call_operand.vmem [shape: f32[8,1], index: 2, kind: input, shape index: {}]   ;;  %s565_s3 = inlined_call_operand.hbm [shape: f32[8,128], index: 3, kind: output, shape index: {}]  }
   0x1   :  { %v19_v0 = vld [vmem:[%s562_s0 + $0x18] sm:$0x7]  ;;  %398 = vmatprep.subr.mxu0 %v469_v2  ;;  %409 = vmatprep.subr.mxu1 %v469_v2  ;;  %v18_v3 = vld [vmem:[%s562_s0 + $0x10] sm:$0xff]  ;;  %v17_v5 = vld [vmem:[%s562_s0 + $0x8] sm:$0xff] }
   0x2   :  { %v363_v1 = vld [vmem:[%s562_s0 + $0x38] sm:$0x7]  ;;  %v362_v4 = vld [vmem:[%s562_s0 + $0x30] sm:$0xff]  ;;  %399 = vmatpush3.msk.msra.mxu0 %vm24_vm0, %v19_v0  ;;  %v361_v6 = vld [vmem:[%s562_s0 + $0x28] sm:$0xff] }
   0x3   :  { %410 = vmatpush3.msk.msra.mxu1 %vm24_vm0, %v363_v1  ;;  %400 = vmatprep.subr.mxu0 %v469_v2  ;;  %v16_v7 = vld [vmem:[%s562_s0] sm:$0xff] }
   0x4   :  { %411 = vmatprep.subr.mxu1 %v469_v2  ;;  %401 = vmatpush3.msra.mxu0 %v18_v3  ;;  %v360_v8 = vld [vmem:[%s562_s0 + $0x20] sm:$0xff] }
   0x5   :  { %412 = vmatpush3.msra.mxu1 %v362_v4  ;;  %402 = vmatprep.subr.mxu0 %v469_v2  ;;  %v15_v9 = vld [vmem:[%s563_s1] sm:$0xff] }
   0x6   :  { %413 = vmatprep.subr.mxu1 %v469_v2  ;;  %403 = vmatpush3.msra.mxu0 %v17_v5 }
   0x7   :  { %414 = vmatpush3.msra.mxu1 %v361_v6 }
   0x8   :  { %8 = vsyncpa [#allocation3], 0  ;;  %404 = vmatprep.subr.mxu0 %v469_v2  ;;  %415 = vmatprep.subr.mxu1 %v469_v2  ;;  %vm470_vm2 = vmmov 0   ;;  %v369_v10 = vld [vmem:[%s562_s0 + $0x58] sm:$0x7]  ;;  %v368_v12 = vld [vmem:[%s562_s0 + $0x50] sm:$0xff] }
   0x9   :  { %405 = vmatpush3.msra.mxu0 %v16_v7  ;;  %406 = vmatprep.mubr.msk.f32.mxu0 %vm470_vm2, %v469_v2  ;;  %v375_v11 = vld [vmem:[%s562_s0 + $0x78] sm:$0x7]  ;;  %v374_v13 = vld [vmem:[%s562_s0 + $0x70] sm:$0xff]  ;;  %v367_v14 = vld [vmem:[%s562_s0 + $0x48] sm:$0xff]  ;;  %v471_v19 = vmov 0  }
   0xa   :  { %416 = vmatpush3.msra.mxu1 %v360_v8  ;;  %407 = vmatmul.mubr.msk.f32.vlgmr.msra.gmra.mxu0 %vm20_vm1, %v15_v9  ;;  %v373_v15 = vld [vmem:[%s562_s0 + $0x68] sm:$0xff]  ;;  %v366_v16 = vld [vmem:[%s562_s0 + $0x40] sm:$0xff] }
   0xb   :  { %417 = vmatprep.mubr.msk.f32.mxu1 %vm470_vm2, %v469_v2  ;;  %420 = vmatprep.subr.mxu0 %v469_v2  ;;  %v372_v17 = vld [vmem:[%s562_s0 + $0x60] sm:$0xff]  ;;  %s472_s0 = smov [#allocation2]  }
   0xc   :  { %431 = vmatprep.subr.mxu1 %v469_v2  ;;  %418 = vmatmul.mubr.msk.f32.vlgmr.msra.gmra.mxu1 %vm20_vm1, %v15_v9  ;;  %v335_v18 = vld [vmem:[%s564_s2] sm:$0xff]  ;;  %s350_s2 = sshll.u32 %s472_s0, 4  ;;  %s351_s2 = int_to_ptr.vmem [resolvable:$true] %s350_s2 }
   0xd   :  { %421 = vmatpush3.msk.msra.mxu0 %vm24_vm0, %v369_v10  ;;  %432 = vmatpush3.msk.msra.mxu1 %vm24_vm0, %v375_v11  ;;  %s447_s20 = scalar_lea.vmem %s351_s2, 128  ;;  %p452_p1 = scmp.lt.s32.totalorder %s351_s2, %s351_s2 }
   0xe   :  { %422 = vmatprep.subr.mxu0 %v469_v2  ;;  %433 = vmatprep.subr.mxu1 %v469_v2  ;;  %p448_p0 = scmp.ne.s32.totalorder %s351_s2, %s447_s20  ;;  %p453_p2 = scmp.lt.s32.totalorder %s447_s20, %s447_s20 }
   0xf   :  { %423 = vmatpush3.msra.mxu0 %v368_v12  ;;  %434 = vmatpush3.msra.mxu1 %v374_v13 }
  0x10   :  { %424 = vmatprep.subr.mxu0 %v469_v2  ;;  %435 = vmatprep.subr.mxu1 %v469_v2  ;;  %p454_p3 = por %p453_p2, %p452_p1 }
  0x11   :  { %425 = vmatpush3.msra.mxu0 %v367_v14  ;;  %436 = vmatpush3.msra.mxu1 %v373_v15 }
  0x12   :  { %426 = vmatprep.subr.mxu0 %v469_v2  ;;  %437 = vmatprep.subr.mxu1 %v469_v2  ;;  %p455_p4 = pnand %p454_p3, %p448_p0 }
  0x13   :  { %427 = vmatpush3.msra.mxu0 %v366_v16  ;;  %428 = vmatprep.mubr.msk.f32.mxu0 %vm470_vm2, %v469_v2 }
  0x14   :  { %438 = vmatpush3.msra.mxu1 %v372_v17  ;;  %439 = vmatprep.mubr.msk.f32.mxu1 %vm470_vm2, %v469_v2 }
  0x15   :  { %429 = vmatmul.mubr.msk.f32.vlgmr.msra.gmra.mxu0 %vm20_vm1, %v15_v9  ;;  %440 = vmatmul.mubr.msk.f32.vlgmr.msra.gmra.mxu1 %vm20_vm1, %v15_v9 }
  0x16   :  { %446 = vset.pattern.permute.xlu0 %v471_v19 }
  0x17   :  { %338 = vperm.xlu0 %446, %v335_v18  }
  0x92   :  { %v339_v28 = vpop.permute.xlu0 %338 }
  0xca   :  { %v94_v20 = vpop.f32.mrf.mxu0 }
  0xcc   :  { %v172_v21 = vpop.f32.mrf.mxu1  ;;  %v408_v22 = vpop.f32.mrf.mxu0 }
  0xcd   :  { %v176_v24 = vmax.f32 %v94_v20, %v172_v21 }
  0xce   :  { %v419_v23 = vpop.f32.mrf.mxu1 }
  0xd5   :  { %v251_v25 = vpop.f32.mrf.mxu0  ;;  %v330_v26 = vpop.f32.mrf.mxu1 }
  0xd6   :  { %v255_v27 = vmax.f32 %v176_v24, %v251_v25 }
  0xd7   :  { %v430_v29 = vpop.f32.mrf.mxu0  ;;  %v441_v30 = vpop.f32.mrf.mxu1 }
  0xd8   :  { %v334_v31 = vmax.f32 %v255_v27, %v330_v26 }
  0xda   :  { %v341_v32 = vadd.f32 %v339_v28, %v334_v31 }
  0xdc   :  { %v342_v33 = vmax.f32 %v341_v32, 0.0 }
  0xde   :  { %343 = vst [vmem:[#allocation2] sm:$0xff] %v342_v33 }
  0xdf   :  { %458 = shalt.err (!%p455_p4)
}
  0xe0   :  { %353 = dma.vmem_to_hbm [thread:$0]  %s351_s2, 128, %s565_s3, [#allocation3]  }
  0xe1   :  { %467 = dma.done.wait [#allocation3], 128  }
  0xe2   :  { %468 = vsyncadd [#allocation3], 4294967168 }
  0xe3   :  { %357 = vsyncpa [#allocation3], 1 }

</bundles_post_ra>
